<compile_context>
chip_gen: v7x
topology: tpu7x:2x2x1
jax: 0.10.0
libtpu: 0.0.40
codegen_flags: <defaults>
</compile_context>

<pallas_src>
import jax
import jax.numpy as jnp
from jax.experimental import pallas as pl
from jax.experimental.pallas import tpu as pltpu

_FLAG_IDX = 2          # the module hardcodes self.i = 2
_SMALL_ELEMS = 16384   # below this, let XLA fuse the formula (launch-bound regime)


# --------------------------------------------------------------------------
# Parameter-time precompute of the `move` registered buffer (1, N)
# --------------------------------------------------------------------------
def make_move_buffer(order):
    move_vals = [0.0] * len(order)
    for k in ("control", "end", "flag"):
        if k in order:
            move_vals[order.index(k)] = 1.0
    return jnp.asarray([move_vals], dtype=jnp.float32)


def _round_up(x, m):
    return ((x + m - 1) // m) * m


# --------------------------------------------------------------------------
# Default layout: action is (B, N), batch on the sublane dim (module layout)
# --------------------------------------------------------------------------
def _action_mask_kernel(act_ref, move_ref, o_ref):
    # act_ref: (tb, N) f32, move_ref: (1, N) f32, o_ref: (tb, N) f32
    act = act_ref[...]                              # (tb, N)
    move = move_ref[...]                            # (1, N), resident across steps
    flag = act[:, _FLAG_IDX:_FLAG_IDX + 1]          # (tb, 1) static slice, in vregs
    mask = move + flag * (1.0 - move)               # broadcast -> (tb, N)
    o_ref[...] = act * mask


def _pick_block_b(B, block_b, max_rows=65536):
    if block_b is None:
        # ~2 grid steps: feeds both v7x TensorCores, still only 2 steps of
        # ~0.35us overhead on single-TC v6e/v5e.
        block_b = pl.cdiv(B, 2) if B > 8 else B
    block_b = min(block_b, B, max_rows)
    if block_b < B:
        # Sublane dim must be a multiple of 8 (or the full array dim).
        block_b = max(8, _round_up(block_b, 8))
        block_b = min(block_b, max_rows)
    return block_b


def _action_mask_pallas(action, move, *, block_b=None):
    B, N = action.shape
    block_b = _pick_block_b(B, block_b)
    grid_b = pl.cdiv(B, block_b)

    return pl.pallas_call(
        _action_mask_kernel,
        out_shape=jax.ShapeDtypeStruct((B, N), jnp.float32),
        grid=(grid_b,),
        in_specs=[
            pl.BlockSpec((block_b, N), lambda i: (i, 0)),   # action tile over batch
            pl.BlockSpec((1, N), lambda i: (0, 0)),          # move buffer, resident
        ],
        out_specs=pl.BlockSpec((block_b, N), lambda i: (i, 0)),
        compiler_params=pltpu.CompilerParams(
            dimension_semantics=("parallel",)),
        cost_estimate=pl.CostEstimate(
            flops=4 * B * N, transcendentals=0,
            bytes_accessed=(2 * B * N + N) * 4),
    )(action, move)


def action_mask_forward(action, move, *, block_b=None, force_pallas=False):
    """action: (B, N) f32; move: (1, N) f32 (precomputed buffer)."""
    B, N = action.shape
    assert N > _FLAG_IDX, "ActionMask requires at least 3 action components"
    if not force_pallas and B * N < _SMALL_ELEMS:
        # Launch-overhead-bound regime: plain jnp so XLA fuses it with neighbours.
        flag = action[:, _FLAG_IDX:_FLAG_IDX + 1]
        return action * (move + flag * (1.0 - move))
    return _action_mask_pallas(action, move, block_b=block_b)


# --------------------------------------------------------------------------
# Lane-dense layout: action_t is (N, B), batch on the lane dim.
# Use only when the producer already emits this layout (a standalone HBM
# transpose just for this op would cost more than it saves).
# --------------------------------------------------------------------------
def _action_mask_kernel_t(act_ref, move_ref, o_ref):
    # act_ref: (N, tb) f32, move_ref: (N, 1) f32, o_ref: (N, tb) f32
    act = act_ref[...]                              # (N, tb)
    move = move_ref[...]                            # (N, 1)
    flag = act[_FLAG_IDX:_FLAG_IDX + 1, :]          # (1, tb) sublane slice, cheap
    mask = move + flag * (1.0 - move)               # broadcast -> (N, tb)
    o_ref[...] = act * mask


def action_mask_forward_lane_dense(action_t, move_t, *, block_b=None,
                                   max_lanes=131072):
    """action_t: (N, B) f32; move_t: (N, 1) f32. Returns (N, B)."""
    N, B = action_t.shape
    assert N > _FLAG_IDX, "ActionMask requires at least 3 action components"
    if block_b is None:
        block_b = pl.cdiv(B, 2) if B >= 256 else B
    block_b = min(block_b, B, max_lanes)
    if block_b < B:
        # Lane dim must be a multiple of 128 (or the full array dim).
        block_b = max(128, _round_up(block_b, 128))
        block_b = min(block_b, max_lanes)
    grid_b = pl.cdiv(B, block_b)

    return pl.pallas_call(
        _action_mask_kernel_t,
        out_shape=jax.ShapeDtypeStruct((N, B), jnp.float32),
        grid=(grid_b,),
        in_specs=[
            pl.BlockSpec((N, block_b), lambda i: (0, i)),   # batch tiles on lanes
            pl.BlockSpec((N, 1), lambda i: (0, 0)),          # move buffer, resident
        ],
        out_specs=pl.BlockSpec((N, block_b), lambda i: (0, i)),
        compiler_params=pltpu.CompilerParams(
            dimension_semantics=("parallel",)),
        cost_estimate=pl.CostEstimate(
            flops=4 * B * N, transcendentals=0,
            bytes_accessed=(2 * B * N + N) * 4),
    )(action_t, move_t)


# --------------------------------------------------------------------------
# Demo / correctness check
# --------------------------------------------------------------------------
if __name__ == "__main__":
    order = ["x", "y", "flag", "control", "end", "color", "width", "brush"]
    N = len(order)
    move = make_move_buffer(order)                  # (1, N), built once

    key = jax.random.PRNGKey(0)

    def ref_forward(a):
        flag = a[:, _FLAG_IDX:_FLAG_IDX + 1]
        return a * (move + flag * (1.0 - move))

    # 1) Tiny batch: dispatch falls back to fused jnp (no pallas_call).
    k1, k2 = jax.random.split(key)
    a_small = jax.random.uniform(k1, (8, N), jnp.float32, 0.0, 1.0)
    out_small = jax.block_until_ready(action_mask_forward(a_small, move))
    assert out_small.shape == (8, N)
    assert jnp.allclose(out_small, ref_forward(a_small), atol=1e-6)

    # 2) Pallas (B, N) path, forced at a small-but-tiled shape (grid of 2).
    B = 256
    a = jax.random.uniform(k2, (B, N), jnp.float32, 0.0, 1.0)
    out = jax.block_until_ready(
        action_mask_forward(a, move, force_pallas=True))
    ref = ref_forward(a)
    assert out.shape == (B, N)
    assert jnp.allclose(out, ref, atol=1e-6), "mismatch vs reference (B,N path)"

    # 3) Lane-dense (N, B) path for producers that emit the transposed layout.
    a_t = a.T                                       # (N, B), batch on lanes
    move_t = move.T                                 # (N, 1)
    out_t = jax.block_until_ready(
        action_mask_forward_lane_dense(a_t, move_t))
    assert out_t.shape == (N, B)
    assert jnp.allclose(out_t, ref.T, atol=1e-6), "mismatch vs reference (N,B path)"

    print("KERNEL_OK")
</pallas_src>

<mosaic_0001>
module attributes {stable_mosaic.version = 11 : i64} {
  func.func @_action_mask_kernel(%arg0: i32, %arg1: memref<128x8xf32, #tpu.memory_space<vmem>>, %arg2: memref<1x8xf32, #tpu.memory_space<vmem>>, %arg3: memref<128x8xf32, #tpu.memory_space<vmem>>) attributes {dimension_semantics = [#tpu.dimension_semantics<parallel>], iteration_bounds = array<i64: 2>, scalar_prefetch = 0 : i64, scratch_operands = 0 : i64, tpu.core_type = #tpu.core_type<tc>, window_params = [{transform_indices = @transform_0, window_bounds = array<i64: 128, 8>}, {pipeline_mode = #tpu.pipeline_mode<synchronous>, transform_indices = @transform_1, window_bounds = array<i64: 1, 8>}, {transform_indices = @transform_2, window_bounds = array<i64: 128, 8>}]} {
    %c0 = arith.constant 0 : index
    %c0_0 = arith.constant 0 : index
    %0 = vector.load %arg1[%c0, %c0_0] : memref<128x8xf32, #tpu.memory_space<vmem>>, vector<128x8xf32>
    %c0_1 = arith.constant 0 : index
    %c0_2 = arith.constant 0 : index
    %1 = vector.load %arg2[%c0_1, %c0_2] : memref<1x8xf32, #tpu.memory_space<vmem>>, vector<1x8xf32>
    %2 = vector.extract_strided_slice %0 {offsets = [0, 2], sizes = [128, 1], strides = [1, 1]} : vector<128x8xf32> to vector<128x1xf32>
    %cst = arith.constant 1.000000e+00 : f32
    %3 = vector.broadcast %cst : f32 to vector<1x8xf32>
    %4 = arith.subf %3, %1 : vector<1x8xf32>
    %5 = vector.broadcast %2 : vector<128x1xf32> to vector<128x8xf32>
    %6 = vector.broadcast %4 : vector<1x8xf32> to vector<128x8xf32>
    %7 = arith.mulf %5, %6 : vector<128x8xf32>
    %8 = vector.broadcast %1 : vector<1x8xf32> to vector<128x8xf32>
    %9 = arith.addf %8, %7 : vector<128x8xf32>
    %10 = arith.mulf %0, %9 : vector<128x8xf32>
    %c0_3 = arith.constant 0 : index
    %c0_4 = arith.constant 0 : index
    %11 = vector.load %arg3[%c0_3, %c0_4] : memref<128x8xf32, #tpu.memory_space<vmem>>, vector<128x8xf32>
    tpu.vector_store %arg3[%c0_3, %c0_4], %10 {strides = array<i32>} : memref<128x8xf32, #tpu.memory_space<vmem>>, vector<128x8xf32>,
    return
  }
  func.func @transform_0(%arg0: i32) -> (i32, i32) {
    %c0_i32 = arith.constant 0 : i32
    %c0_i32_0 = arith.constant 0 : i32
    return %arg0, %c0_i32 : i32, i32
  }
  func.func @transform_1(%arg0: i32) -> (i32, i32) {
    %c0_i32 = arith.constant 0 : i32
    %c0_i32_0 = arith.constant 0 : i32
    %c0_i32_1 = arith.constant 0 : i32
    return %c0_i32, %c0_i32_0 : i32, i32
  }
  func.func @transform_2(%arg0: i32) -> (i32, i32) {
    %c0_i32 = arith.constant 0 : i32
    %c0_i32_0 = arith.constant 0 : i32
    return %arg0, %c0_i32 : i32, i32
  }
}

</mosaic_0001>

<bundles_post_ra>
// kernel: tpu_custom_call.1
= control target key start
LH: loop header
LB: loop body
LE: loop exit
PB: predicated region body
PF: predicated region fallthrough
CT: control target
= control target key end

     0   :  { %s424_s9 = smov 0   ;;  %s561_s0 = inlined_call_operand.vmem [shape: f32[256,8], index: 0, kind: input, shape index: {}]   ;;  %s562_s1 = inlined_call_operand.vmem [shape: f32[1,8], index: 1, kind: input, shape index: {}]   ;;  %s563_s2 = inlined_call_operand.vmem [shape: f32[256,8], index: 2, kind: output, shape index: {}]  }
   0x1 LB: > { %s378_s10 = sadd.s32 4294967295, %s406_s9   ;;  %p382_p0 = scmp.ge.s32.totalorder %s406_s9, 1  ;;  %s406_s9 = sphi %s424_s9, %s12_s9  }
   0x2   : > { %p113_p1 = scmp.lt.s32.totalorder %s406_s9, 3 }
   0x4   : > { %p114_p2 = pnand %p382_p0, %p113_p1 }
   0x5   : > { %s383_s11 = sshll.u32 (!%p114_p2), %s378_s10, 4  ;;  %v408_v0 = vmov (!%p114_p2), 2   ;;  %v246_v17 = vlaneseq (!%p114_p2)  ;;  %v163_v19 = vld [vmem:[%s562_s1] sm:$0x1] (!%p114_p2)  ;;  %vm305_vm0 = vcmask (!%p114_p2), 64512  }
   0x6   : > { %117 = sbr.rel (%p114_p2) target bundleno = 180 (0xb4), region = 28  ;;  %399 = vset.pattern.permute.xlu1 (!%p114_p2), %v408_v0  ;;  %398 = vset.pattern.permute.xlu0 (!%p114_p2), %v408_v0  ;;  %p136_p3 = scmp.lt.s32.totalorder (!%p114_p2), %s383_s11, 31  ;;  %v164_v20 = vsub.f32 (!%p114_p2), 1.0, %v163_v19 }
   0x7   : > { %v247_v18 = vshrl.u32 (!%p114_p2), %v246_v17, 7 }
   0x9   : > { %v248_v21 = vsub.s32 (!%p114_p2), 0, %v247_v18 }
   0xb   : > { %v473_v22 = vrot.slane (!%p114_p2), %v164_v20, %v248_v21  ;;  %v475_v23 = vrot.slane (!%p114_p2), %v163_v19, %v248_v21 }
   0xd   : > { %s565_s11 = smov (!%p136_p3, %s383_s11), 31 }
   0xe   : > { %s384_s12 = sshll.u32 %s565_s11, 3 }
   0xf   : > { %s139_s15 = scalar_lea.vmem %s561_s0, %s384_s12  ;;  %s486_s20 = scalar_lea.vmem %s563_s2, %s384_s12 }
  0x10   : > { %v149_v1 = vld [vmem:[%s139_s15 + $0x10] sm:$0xff]  ;;  %v147_v2 = vld [vmem:[%s139_s15] sm:$0xff]  ;;  %v150_v3 = vld [vmem:[%s139_s15 + $0x18] sm:$0xff] }
  0x11   : > { %177 = vperm.xlu1 %399, %v149_v1   ;;  %167 = vperm.xlu0 %398, %v147_v2   ;;  %v148_v4 = vld [vmem:[%s139_s15 + $0x8] sm:$0xff]  ;;  %v151_v6 = vld [vmem:[%s139_s15 + $0x20] sm:$0xff]  ;;  %v440_v7 = vld [vmem:[%s139_s15 + $0x38] sm:$0xff] }
  0x12   : > { %v152_v5 = vld [vmem:[%s139_s15 + $0x28] sm:$0xff]  ;;  %v442_v8 = vld [vmem:[%s139_s15 + $0x30] sm:$0xff]  ;;  %v448_v10 = vld [vmem:[%s139_s15 + $0x40] sm:$0xff] }
  0x13   : > { %v446_v9 = vld [vmem:[%s139_s15 + $0x48] sm:$0xff]  ;;  %v452_v11 = vld [vmem:[%s139_s15 + $0x58] sm:$0xff]  ;;  %v454_v12 = vld [vmem:[%s139_s15 + $0x50] sm:$0xff] }
  0x14   : > { %v458_v13 = vld [vmem:[%s139_s15 + $0x68] sm:$0xff]  ;;  %v460_v14 = vld [vmem:[%s139_s15 + $0x60] sm:$0xff]  ;;  %v464_v15 = vld [vmem:[%s139_s15 + $0x78] sm:$0xff] }
  0x15   : > { %182 = vperm.xlu1 %399, %v150_v3   ;;  %172 = vperm.xlu0 %398, %v148_v4   ;;  %v466_v16 = vld [vmem:[%s139_s15 + $0x70] sm:$0xff] }
  0x19   : > { %192 = vperm.xlu1 %399, %v152_v5   ;;  %187 = vperm.xlu0 %398, %v151_v6  }
  0x1d   : > { %202 = vperm.xlu1 %399, %v440_v7   ;;  %197 = vperm.xlu0 %398, %v442_v8  }
  0x21   : > { %212 = vperm.xlu1 %399, %v446_v9   ;;  %207 = vperm.xlu0 %398, %v448_v10  }
  0x25   : > { %222 = vperm.xlu1 %399, %v452_v11   ;;  %217 = vperm.xlu0 %398, %v454_v12  }
  0x29   : > { %232 = vperm.xlu1 %399, %v458_v13   ;;  %227 = vperm.xlu0 %398, %v460_v14  }
  0x2d   : > { %242 = vperm.xlu1 %399, %v464_v15   ;;  %237 = vperm.xlu0 %398, %v466_v16  }
  0x90   : > { %v178_v24 = vpop.permute.xlu1 %177  ;;  %v168_v25 = vpop.permute.xlu0 %167 }
  0x91   : > { %v253_v26 = vmul.f32 %v473_v22, %v178_v24  ;;  %v251_v27 = vmul.f32 %v473_v22, %v168_v25 }
  0x93   : > { %v275_v28 = vadd.f32 %v475_v23, %v253_v26  ;;  %v273_v29 = vadd.f32 %v475_v23, %v251_v27 }
  0x94   : > { %v183_v30 = vpop.permute.xlu1 %182  ;;  %v173_v31 = vpop.permute.xlu0 %172 }
  0x95   : > { %v291_v32 = vmul.f32 %v275_v28, %v149_v1  ;;  %v289_v33 = vmul.f32 %v273_v29, %v147_v2  ;;  %v254_v34 = vmul.f32 %v473_v22, %v183_v30  ;;  %v252_v35 = vmul.f32 %v473_v22, %v173_v31 }
  0x97   : > { %308 = vst.msk [vmem:[%s486_s20 + $0x10] sm:$0xff] %vm305_vm0, %v291_v32  ;;  %306 = vst.msk [vmem:[%s486_s20] sm:$0xff] %vm305_vm0, %v289_v33  ;;  %v276_v36 = vadd.f32 %v475_v23, %v254_v34  ;;  %v274_v37 = vadd.f32 %v475_v23, %v252_v35 }
  0x98   : > { %v193_v38 = vpop.permute.xlu1 %192  ;;  %v188_v39 = vpop.permute.xlu0 %187 }
  0x99   : > { %v292_v40 = vmul.f32 %v276_v36, %v150_v3  ;;  %v290_v41 = vmul.f32 %v274_v37, %v148_v4  ;;  %v256_v42 = vmul.f32 %v473_v22, %v193_v38  ;;  %v255_v43 = vmul.f32 %v473_v22, %v188_v39 }
  0x9b   : > { %309 = vst.msk [vmem:[%s486_s20 + $0x18] sm:$0xff] %vm305_vm0, %v292_v40  ;;  %307 = vst.msk [vmem:[%s486_s20 + $0x8] sm:$0xff] %vm305_vm0, %v290_v41  ;;  %v278_v44 = vadd.f32 %v475_v23, %v256_v42  ;;  %v277_v45 = vadd.f32 %v475_v23, %v255_v43 }
  0x9c   : > { %v203_v46 = vpop.permute.xlu1 %202  ;;  %v198_v47 = vpop.permute.xlu0 %197 }
  0x9d   : > { %v294_v48 = vmul.f32 %v278_v44, %v152_v5  ;;  %v293_v49 = vmul.f32 %v277_v45, %v151_v6  ;;  %v258_v50 = vmul.f32 %v473_v22, %v203_v46  ;;  %v257_v51 = vmul.f32 %v473_v22, %v198_v47 }
  0x9f   : > { %311 = vst.msk [vmem:[%s486_s20 + $0x28] sm:$0xff] %vm305_vm0, %v294_v48  ;;  %310 = vst.msk [vmem:[%s486_s20 + $0x20] sm:$0xff] %vm305_vm0, %v293_v49  ;;  %v280_v52 = vadd.f32 %v475_v23, %v258_v50  ;;  %v279_v53 = vadd.f32 %v475_v23, %v257_v51 }
  0xa0   : > { %v213_v54 = vpop.permute.xlu1 %212  ;;  %v208_v55 = vpop.permute.xlu0 %207 }
  0xa1   : > { %v296_v56 = vmul.f32 %v280_v52, %v440_v7  ;;  %v295_v57 = vmul.f32 %v279_v53, %v442_v8  ;;  %v260_v58 = vmul.f32 %v473_v22, %v213_v54  ;;  %v259_v59 = vmul.f32 %v473_v22, %v208_v55 }
  0xa3   : > { %313 = vst.msk [vmem:[%s486_s20 + $0x38] sm:$0xff] %vm305_vm0, %v296_v56  ;;  %312 = vst.msk [vmem:[%s486_s20 + $0x30] sm:$0xff] %vm305_vm0, %v295_v57  ;;  %v282_v60 = vadd.f32 %v475_v23, %v260_v58  ;;  %v281_v61 = vadd.f32 %v475_v23, %v259_v59 }
  0xa4   : > { %v223_v62 = vpop.permute.xlu1 %222  ;;  %v218_v63 = vpop.permute.xlu0 %217 }
  0xa5   : > { %v298_v0 = vmul.f32 %v282_v60, %v446_v9  ;;  %v297_v1 = vmul.f32 %v281_v61, %v448_v10  ;;  %v262_v2 = vmul.f32 %v473_v22, %v223_v62  ;;  %v261_v3 = vmul.f32 %v473_v22, %v218_v63 }
  0xa7   : > { %315 = vst.msk [vmem:[%s486_s20 + $0x48] sm:$0xff] %vm305_vm0, %v298_v0  ;;  %314 = vst.msk [vmem:[%s486_s20 + $0x40] sm:$0xff] %vm305_vm0, %v297_v1  ;;  %v284_v4 = vadd.f32 %v475_v23, %v262_v2  ;;  %v283_v5 = vadd.f32 %v475_v23, %v261_v3 }
  0xa8   : > { %v233_v6 = vpop.permute.xlu1 %232  ;;  %v228_v7 = vpop.permute.xlu0 %227 }
  0xa9   : > { %v300_v8 = vmul.f32 %v284_v4, %v452_v11  ;;  %v299_v9 = vmul.f32 %v283_v5, %v454_v12  ;;  %v264_v10 = vmul.f32 %v473_v22, %v233_v6  ;;  %v263_v17 = vmul.f32 %v473_v22, %v228_v7 }
  0xab   : > { %317 = vst.msk [vmem:[%s486_s20 + $0x58] sm:$0xff] %vm305_vm0, %v300_v8  ;;  %316 = vst.msk [vmem:[%s486_s20 + $0x50] sm:$0xff] %vm305_vm0, %v299_v9  ;;  %v286_v18 = vadd.f32 %v475_v23, %v264_v10  ;;  %v285_v19 = vadd.f32 %v475_v23, %v263_v17 }
  0xac   : > { %v243_v20 = vpop.permute.xlu1 %242  ;;  %v238_v21 = vpop.permute.xlu0 %237 }
  0xad   : > { %v302_v11 = vmul.f32 %v286_v18, %v458_v13  ;;  %v301_v12 = vmul.f32 %v285_v19, %v460_v14  ;;  %v266_v24 = vmul.f32 %v473_v22, %v243_v20  ;;  %v265_v25 = vmul.f32 %v473_v22, %v238_v21 }
  0xaf   : > { %319 = vst.msk [vmem:[%s486_s20 + $0x68] sm:$0xff] %vm305_vm0, %v302_v11  ;;  %318 = vst.msk [vmem:[%s486_s20 + $0x60] sm:$0xff] %vm305_vm0, %v301_v12  ;;  %v288_v26 = vadd.f32 %v475_v23, %v266_v24  ;;  %v287_v27 = vadd.f32 %v475_v23, %v265_v25 }
  0xb1   : > { %v304_v28 = vmul.f32 %v288_v26, %v464_v15  ;;  %v303_v29 = vmul.f32 %v287_v27, %v466_v16 }
  0xb3   : > { %321 = vst.msk [vmem:[%s486_s20 + $0x78] sm:$0xff] %vm305_vm0, %v304_v28  ;;  %320 = vst.msk [vmem:[%s486_s20 + $0x70] sm:$0xff] %vm305_vm0, %v303_v29 }
  0xb4 PF: > { %s12_s9 = sadd.s32 1, %s406_s9  }
  0xb5   : > { %p9_p4 = scmp.ge.s32.totalorder %s12_s9, 4  }
  0xb7   :  { %11 = sbr.rel (!%p9_p4) target bundleno = 1 (0x1), region = 58 }

</bundles_post_ra>
